<compile_context>
chip_gen: v7x
topology: tpu7x:2x2x1
jax: 0.10.0
libtpu: 0.0.40
codegen_flags: <defaults>
</compile_context>

<pallas_src>
import jax
import jax.numpy as jnp
from jax import lax
from jax.experimental import pallas as pl
from jax.experimental.pallas import tpu as pltpu

K = 3  # kernel_size; MaxPool2d default stride == kernel_size, padding = 0


def _neg_fill(dtype):
    """Finite 'never wins the max' fill value for the given dtype."""
    if jnp.issubdtype(dtype, jnp.floating):
        return jnp.finfo(dtype).min
    return jnp.iinfo(dtype).min


def _maxpool3x3_kernel(x_ref, o_ref):
    # x_ref: (bc, H, W)  -- bc fused batch*channel rows, full spatial extent
    # o_ref: (bc*Ho, Wo) -- lane-dense flattened output rows
    bc, H, W = x_ref.shape
    Wo = o_ref.shape[-1]
    Ho = o_ref.shape[0] // bc
    Hp = K * Ho
    dtype = x_ref.dtype
    neg = _neg_fill(dtype)

    x = x_ref[...]                                              # (bc, H, W)

    # ---- H (sublane) direction: stride-3 window max ------------------------
    if Hp > H:  # ceil_mode bottom edge
        x = jnp.concatenate(
            [x, jnp.full((bc, Hp - H, W), neg, dtype)], axis=1)  # (bc, Hp, W)
    x = x.reshape(bc * Ho, K, W)                                # group rows by 3
    y = jnp.max(x, axis=1)                                      # (bc*Ho, W)

    # ---- W (lane) direction: stride-3 window max ----------------------------
    ys = jnp.concatenate(
        [y, jnp.full((bc * Ho, K - 1), neg, dtype)], axis=1)    # (bc*Ho, W+2)
    m = jnp.maximum(jnp.maximum(ys[:, 0:W], ys[:, 1:W + 1]), ys[:, 2:W + 2])
    # m[:, w] = max over input columns w, w+1, w+2 (edge uses dtype-min fill)

    # Compact columns 0, 3, ..., 3*(Wo-1) with an exact 0/1 selection matmul.
    r = lax.broadcasted_iota(jnp.int32, (W, Wo), 0)
    c = lax.broadcasted_iota(jnp.int32, (W, Wo), 1)
    sel = (r == K * c)
    if jnp.issubdtype(dtype, jnp.floating):
        md, seld = m, sel.astype(dtype)
    else:
        # TODO(synk): integer inputs with |value| > 2**24 lose precision in the
        # f32 selection matmul (v7x MXU has no int path); float inputs are exact.
        md, seld = m.astype(jnp.float32), sel.astype(jnp.float32)
    out = jnp.dot(md, seld, preferred_element_type=jnp.float32)  # (bc*Ho, Wo)
    o_ref[...] = out.astype(o_ref.dtype)


def maxpool2d_k3_ceil(x):
    """MaxPool2d(kernel_size=3, stride=3, padding=0, ceil_mode=True) on NCHW."""
    N, C, H, W = x.shape
    Ho = pl.cdiv(H, K)
    Wo = pl.cdiv(W, K)
    NC = N * C

    x2 = x.reshape(NC, H, W)  # free view-like reshape: no transpose, no pad

    # Block size along the fused N*C dim: target ~1 MiB input tiles.  With
    # Pallas double-buffering (2x input + 2x output blocks + temporaries) this
    # stays well inside v5e's 16 MiB default scoped VMEM and v7x's 32 MiB.
    itemsize = jnp.dtype(x.dtype).itemsize
    target_bytes = 1 << 20
    bc = max(1, target_bytes // (H * W * itemsize))
    if bc >= NC:
        bc = NC                       # single block: trailing dims == full dims
    else:
        bc = max(8, (bc // 8) * 8)    # keep output block rows (bc*Ho) 8-divisible
        if bc >= NC:
            bc = NC

    grid = (pl.cdiv(NC, bc),)
    out2d = pl.pallas_call(
        _maxpool3x3_kernel,
        out_shape=jax.ShapeDtypeStruct((NC * Ho, Wo), x.dtype),
        grid=grid,
        in_specs=[pl.BlockSpec((bc, H, W), lambda g: (g, 0, 0))],
        out_specs=pl.BlockSpec((bc * Ho, Wo), lambda g: (g, 0)),
        compiler_params=pltpu.CompilerParams(
            dimension_semantics=("parallel",),
            vmem_limit_bytes=32 * 1024 * 1024,
        ),
    )(x2)

    return out2d.reshape(N, C, Ho, Wo)


class Tudui:
    """JAX/Pallas equivalent of the PyTorch module: MaxPool2d(3, ceil_mode=True).
    No parameters to initialize."""

    def __call__(self, x):
        return maxpool2d_k3_ceil(x)


if __name__ == "__main__":
    key = jax.random.PRNGKey(0)
    x = jax.random.normal(key, (2, 4, 16, 16), dtype=jnp.float32)

    model = Tudui()
    y = jax.block_until_ready(model(x))
    assert y.shape == (2, 4, 6, 6), y.shape  # ceil(16/3) = 6

    # pure-JAX reference: pad with -inf to multiples of 3, reduce 3x3 windows
    xp = jnp.pad(x, ((0, 0), (0, 0), (0, 2), (0, 2)), constant_values=-jnp.inf)
    ref = xp.reshape(2, 4, 6, 3, 6, 3).max(axis=(3, 5))
    assert jnp.allclose(y, ref), "mismatch vs reference maxpool (16x16)"

    # second shape: the tutorial's (-1, 1, 5, 5) toy input (ceil(5/3) = 2)
    x5 = jax.random.normal(jax.random.PRNGKey(1), (1, 1, 5, 5), dtype=jnp.float32)
    y5 = jax.block_until_ready(model(x5))
    assert y5.shape == (1, 1, 2, 2), y5.shape
    xp5 = jnp.pad(x5, ((0, 0), (0, 0), (0, 1), (0, 1)), constant_values=-jnp.inf)
    ref5 = xp5.reshape(1, 1, 2, 3, 2, 3).max(axis=(3, 5))
    assert jnp.allclose(y5, ref5), "mismatch vs reference maxpool (5x5)"

    print("KERNEL_OK")
</pallas_src>

<mosaic_0001>
module attributes {stable_mosaic.version = 11 : i64} {
  func.func @_maxpool3x3_kernel(%arg0: i32, %arg1: memref<8x16x16xf32, #tpu.memory_space<vmem>>, %arg2: memref<48x6xf32, #tpu.memory_space<vmem>>) attributes {dimension_semantics = [#tpu.dimension_semantics<parallel>], iteration_bounds = array<i64: 1>, scalar_prefetch = 0 : i64, scratch_operands = 0 : i64, tpu.core_type = #tpu.core_type<tc>, window_params = [{transform_indices = @transform_0, window_bounds = array<i64: 8, 16, 16>}, {transform_indices = @transform_1, window_bounds = array<i64: 48, 6>}]} {
    %c0 = arith.constant 0 : index
    %c0_0 = arith.constant 0 : index
    %c0_1 = arith.constant 0 : index
    %0 = vector.load %arg1[%c0, %c0_0, %c0_1] : memref<8x16x16xf32, #tpu.memory_space<vmem>>, vector<8x16x16xf32>
    %cst = arith.constant -3.40282347E+38 : f32
    %1 = vector.broadcast %cst : f32 to vector<8x2x16xf32>
    %2 = tpu.concatenate %0, %1 in 1 : vector<8x16x16xf32>, vector<8x2x16xf32> -> vector<8x18x16xf32>
    %3 = vector.shape_cast %2 : vector<8x18x16xf32> to vector<48x3x16xf32>
    %cst_2 = arith.constant dense<0xFF800000> : vector<48x16xf32>
    %4 = vector.multi_reduction <maximumf>, %3, %cst_2 [1] : vector<48x3x16xf32> to vector<48x16xf32>
    %cst_3 = arith.constant -3.40282347E+38 : f32
    %5 = vector.broadcast %cst_3 : f32 to vector<48x2xf32>
    %6 = tpu.concatenate %4, %5 in 1 : vector<48x16xf32>, vector<48x2xf32> -> vector<48x18xf32>
    %7 = vector.extract_strided_slice %6 {offsets = [0, 0], sizes = [48, 16], strides = [1, 1]} : vector<48x18xf32> to vector<48x16xf32>
    %8 = vector.extract_strided_slice %6 {offsets = [0, 1], sizes = [48, 16], strides = [1, 1]} : vector<48x18xf32> to vector<48x16xf32>
    %9 = arith.maximumf %7, %8 : vector<48x16xf32>
    %10 = vector.extract_strided_slice %6 {offsets = [0, 2], sizes = [48, 16], strides = [1, 1]} : vector<48x18xf32> to vector<48x16xf32>
    %11 = arith.maximumf %9, %10 : vector<48x16xf32>
    %12 = tpu.iota {dimensions = array<i32: 0>} : vector<16x6xi32>
    %13 = tpu.iota {dimensions = array<i32: 1>} : vector<16x6xi32>
    %c3_i32 = arith.constant 3 : i32
    %14 = vector.broadcast %c3_i32 : i32 to vector<16x6xi32>
    %15 = arith.muli %14, %13 : vector<16x6xi32>
    %16 = arith.cmpi eq, %12, %15 : vector<16x6xi32>
    %17 = arith.extui %16 : vector<16x6xi1> to vector<16x6xi32>
    %18 = arith.sitofp %17 : vector<16x6xi32> to vector<16x6xf32>
    %cst_4 = arith.constant dense<0.000000e+00> : vector<48x6xf32>
    %19 = tpu.matmul %11, %18, %cst_4 {dimension_numbers = #tpu.dot_dimension_numbers<[1], [0], [0], [1], [0, 0, 1, 1], [], []>} : vector<48x16xf32>, vector<16x6xf32>, vector<48x6xf32> -> vector<48x6xf32>
    %c0_5 = arith.constant 0 : index
    %c0_6 = arith.constant 0 : index
    %20 = vector.load %arg2[%c0_5, %c0_6] : memref<48x6xf32, #tpu.memory_space<vmem>>, vector<48x6xf32>
    tpu.vector_store %arg2[%c0_5, %c0_6], %19 {strides = array<i32>} : memref<48x6xf32, #tpu.memory_space<vmem>>, vector<48x6xf32>,
    return
  }
  func.func @transform_0(%arg0: i32) -> (i32, i32, i32) {
    %c0_i32 = arith.constant 0 : i32
    %c0_i32_0 = arith.constant 0 : i32
    %c0_i32_1 = arith.constant 0 : i32
    return %arg0, %c0_i32, %c0_i32_0 : i32, i32, i32
  }
  func.func @transform_1(%arg0: i32) -> (i32, i32) {
    %c0_i32 = arith.constant 0 : i32
    %c0_i32_0 = arith.constant 0 : i32
    return %arg0, %c0_i32 : i32, i32
  }
}

</mosaic_0001>

<bundles_post_ra>
// kernel: tpu_custom_call.1
= control target key start
LH: loop header
LB: loop body
LE: loop exit
PB: predicated region body
PF: predicated region fallthrough
CT: control target
= control target key end

     0   :  { %6 = vsyncpa [#allocation3], 0  ;;  %s2695_s6 = smov [#allocation2]   ;;  %s3239_s0 = inlined_call_operand.hbm [shape: f32[8,16,16], index: 0, kind: input, shape index: {}]   ;;  %s3240_s1 = inlined_call_operand.vmem [shape: f32[48,6], index: 1, kind: output, shape index: {}]  }
   0x1   :  { %s12_s7 = sshll.u32 %s2695_s6, 4  ;;  %s2671_s10 = scalar_lea.hbm %s3239_s0, 2048  ;;  %s13_s7 = int_to_ptr.vmem [resolvable:$true] %s12_s7 }
   0x2   :  { %p2672_p0 = scmp.ne.s32.totalorder %s3239_s0, %s2671_s10  ;;  %p2675_p1 = scmp.lt.u32.totalorder %s2671_s10, %s3239_s0 }
   0x4   :  { %p2677_p2 = pnand %p2675_p1, %p2672_p0 }
   0x6   :  { %2680 = shalt.err (!%p2677_p2)
}
   0x7   :  { %s2681_s15 = scalar_lea.vmem %s13_s7, 2048  ;;  %p2686_p4 = scmp.lt.s32.totalorder %s13_s7, %s13_s7 }
   0x8   :  { %p2682_p3 = scmp.ne.s32.totalorder %s13_s7, %s2681_s15  ;;  %p2687_p5 = scmp.lt.s32.totalorder %s2681_s15, %s2681_s15 }
   0xa   :  { %p2688_p6 = por %p2687_p5, %p2686_p4 }
   0xc   :  { %p2689_p7 = pnand %p2688_p6, %p2682_p3 }
   0xe   :  { %2692 = shalt.err (!%p2689_p7)
}
   0xf   :  { %s2696_s16 = smov 128   ;;  %s2697_s17 = smov 8  }
  0x10   :  { %18 = dma.hbm_to_vmem [thread:$0]  %s3239_s0, 2048, %s13_s7, [#allocation3], %s2696_s16, %s2696_s16, %s2697_s17  }
  0x11   :  { %2693 = dma.done.wait [#allocation3], 2048  }
  0x12   :  { %2694 = vsyncadd [#allocation3], 4294965248  ;;  %v59_v0 = vlaneseq  ;;  %v2698_v1 = vmov 1966171168   ;;  %v30_v6 = vld [vmem:[#allocation2 + $0x40] sm:$0xff]  ;;  %v31_v7 = vld [vmem:[#allocation2 + $0x48] sm:$0xff] }
  0x13   :  { %v57_v2 = vunpack.c.l.s4 %v2698_v1  ;;  %v32_v8 = vld [vmem:[#allocation2 + $0x50] sm:$0xff]  ;;  %v2699_v9 = vmov -3.4028235e+38   ;;  %v469_v11 = vcombine.high %v30_v6, %v30_v6  ;;  %v518_v13 = vcombine.high %v31_v7, %v31_v7  ;;  %v2746_v31 = vld [vmem:[#allocation2 + $0x58] sm:$0xff]  ;;  %s2700_s0 = smov 126   ;;  %s2701_s20 = smov 127  }
  0x14   :  { %v2726_v3 = vshrl.u32 %v59_v0, 7  ;;  %v567_v17 = vcombine.high %v32_v8, %v32_v8  ;;  %v616_v47 = vcombine.high %v2746_v31, %v2746_v31  ;;  %vm1964_vm0 = vcmask 124928  }
  0x15   :  { %v58_v4 = vunpack.c.0.s8 %v57_v2  ;;  %vm2349_vm1 = vcmask 1041409   ;;  %vm2351_vm2 = vcmask 1042434   ;;  %vm2353_vm3 = vcmask 1043459  }
  0x16   :  { %vm2355_vm4 = vcmask 1044484   ;;  %vm2357_vm5 = vcmask 1045509   ;;  %vm2359_vm6 = vcmask 1046534   ;;  %vm2361_vm7 = vcmask 1047559  }
  0x17   :  { %v2729_v5 = vsub.s32 %v58_v4, %v2726_v3  ;;  %vm2404_vm8 = vcmask 130048   ;;  %vm2590_vm12 = vcmask 48128  }
  0x19   :  { %v159_v10 = vrot.slane %v2699_v9, %v2729_v5  ;;  %v476_v12 = vrot.slane %v30_v6, %v2729_v5  ;;  %v525_v14 = vrot.slane %v31_v7, %v2729_v5  ;;  %v574_v18 = vrot.slane %v32_v8, %v2729_v5 }
  0x1a   :  { %v483_v19 = vrot.slane %v469_v11, %v2729_v5  ;;  %v532_v22 = vrot.slane %v518_v13, %v2729_v5  ;;  %v581_v26 = vrot.slane %v567_v17, %v2729_v5  ;;  %v2760_v50 = vrot.slane %v2746_v31, %v2729_v5 }
  0x1b   :  { %v160_v15 = vcombine.high %v159_v10, %v159_v10  ;;  %v2735_v16 = vrot.slane %v159_v10, %v2729_v5  ;;  %v484_v20 = vcombine.high %v476_v12, %v476_v12  ;;  %v492_v21 = vrot.slane %v476_v12, %v2729_v5 }
  0x1c   :  { %v533_v24 = vcombine.high %v525_v14, %v525_v14  ;;  %v541_v25 = vrot.slane %v525_v14, %v2729_v5  ;;  %v485_v27 = vcombine.high %v483_v19, %v483_v19  ;;  %v499_v28 = vrot.slane %v483_v19, %v2729_v5 }
  0x1d   :  { %v174_v23 = vrot.slane %v160_v15, %v2729_v5  ;;  %v506_v29 = vrot.slane %v484_v20, %v2729_v5  ;;  %v514_v30 = vcombine.high %v492_v21, %v492_v21  ;;  %v534_v32 = vcombine.high %v532_v22, %v532_v22 }
  0x1e   :  { %v548_v33 = vrot.slane %v532_v22, %v2729_v5  ;;  %v555_v34 = vrot.slane %v533_v24, %v2729_v5  ;;  %v563_v35 = vcombine.high %v541_v25, %v541_v25  ;;  %v513_v36 = vrot.slane %v485_v27, %v2729_v5 }
  0x1f   :  { %v516_v37 = vcombine.high %v506_v29, %v506_v29  ;;  %v582_v38 = vcombine.high %v574_v18, %v574_v18  ;;  %v583_v39 = vcombine.high %v581_v26, %v581_v26  ;;  %v562_v40 = vrot.slane %v534_v32, %v2729_v5 }
  0x20   :  { %v564_v41 = vcombine.high %v548_v33, %v548_v33  ;;  %v565_v42 = vcombine.high %v555_v34, %v555_v34  ;;  %v590_v43 = vrot.slane %v574_v18, %v2729_v5  ;;  %v597_v44 = vrot.slane %v581_v26, %v2729_v5 }
  0x21   :  { %v604_v45 = vrot.slane %v582_v38, %v2729_v5  ;;  %v611_v46 = vrot.slane %v583_v39, %v2729_v5  ;;  %v566_v48 = vcombine.high %v562_v40, %v562_v40  ;;  %v2763_v51 = vrot.slane %v174_v23, %v2729_v5 }
  0x22   :  { %v612_v49 = vcombine.high %v590_v43, %v590_v43  ;;  %v1392_v53 = vcombine.low %v492_v21, %v506_v29  ;;  %v1406_v54 = vrot.slane %v514_v30, %v2729_v5  ;;  %v1415_v55 = vcombine.low %v516_v37, %v499_v28 }
  0x23   :  { %v614_v52 = vcombine.high %v604_v45, %v604_v45  ;;  %v631_v56 = vcombine.high %v2760_v50, %v2760_v50  ;;  %v2770_v57 = vrot.slane %v2760_v50, %v2729_v5  ;;  %v1429_v58 = vrot.slane %v513_v36, %v2729_v5 }
  0x24   :  { %v2606_v59 = vcombine.high %v499_v28, %v513_v36  ;;  %v1399_v60 = vrot.slane %v1392_v53, %v2729_v5  ;;  %v1422_v61 = vrot.slane %v1415_v55, %v2729_v5  ;;  %v1452_v62 = vrot.slane %v541_v25, %v2729_v5 }
  0x25   :  { %v1461_v63 = vcombine.low %v555_v34, %v563_v35  ;;  %v661_v1 = vcombine.high %v2770_v57, %v2770_v57  ;;  %v1475_v4 = vrot.slane %v565_v42, %v2729_v5  ;;  %v1484_v6 = vcombine.low %v548_v33, %v562_v40 }
  0x26   :  { %v1445_v2 = vrot.slane %v2606_v59, %v2729_v5  ;;  %v1407_v7 = vcombine.low %v1399_v60, %v1406_v54  ;;  %v1430_v8 = vcombine.low %v1422_v61, %v1429_v58  ;;  %v1498_v10 = vrot.slane %v564_v41, %v2729_v5 }
  0x27   :  { %v1468_v9 = vrot.slane %v1461_v63, %v2729_v5  ;;  %v1491_v12 = vrot.slane %v1484_v6, %v2729_v5  ;;  %v1507_v13 = vcombine.low %v566_v48, %v2735_v16  ;;  %v1523_v14 = vcombine.low %v590_v43, %v604_v45 }
  0x28   :  { %v1453_v11 = vcombine.low %v1445_v2, %v1452_v62  ;;  %v1414_v15 = vrot.slane %v1407_v7, %v2729_v5  ;;  %v1437_v17 = vrot.slane %v1430_v8, %v2729_v5  ;;  %v1537_v19 = vrot.slane %v612_v49, %v2729_v5 }
  0x29   :  { %v1476_v18 = vcombine.low %v1468_v9, %v1475_v4  ;;  %v1499_v21 = vcombine.low %v1491_v12, %v1498_v10  ;;  %v1514_v22 = vrot.slane %v1507_v13, %v2729_v5  ;;  %v1530_v23 = vrot.slane %v1523_v14, %v2729_v5 }
  0x2a   :  { %v1460_v20 = vrot.slane %v1453_v11, %v2729_v5  ;;  %v1546_v25 = vcombine.low %v614_v52, %v597_v44  ;;  %v1560_v26 = vrot.slane %v611_v46, %v2729_v5  ;;  %v2607_v27 = vcombine.high %v597_v44, %v611_v46 }
  0x2b   :  { %v1483_v24 = vrot.slane %v1476_v18, %v2729_v5  ;;  %v1506_v28 = vrot.slane %v1499_v21, %v2729_v5  ;;  %v1515_v29 = vcombine.low %v1514_v22, %v2763_v51  ;;  %v1538_v30 = vcombine.low %v1530_v23, %v1537_v19 }
  0x2c   :  { %v1583_v32 = vrot.slane %v2770_v57, %v2729_v5  ;;  %v1553_v33 = vrot.slane %v1546_v25, %v2729_v5  ;;  %v1576_v34 = vrot.slane %v2607_v27, %v2729_v5  ;;  %v2133_v35 = vsel %vm1964_vm0, %v1414_v15, -inf }
  0x2d   :  { %v2140_v36 = vsel %vm1964_vm0, %v1437_v17, -inf  ;;  %v1522_v37 = vrot.slane %v1515_v29, %v2729_v5  ;;  %v1545_v38 = vrot.slane %v1538_v30, %v2729_v5  ;;  %v2134_v39 = vrot.slane %v2133_v35, 4 }
  0x2e   :  { %v2141_v40 = vrot.slane %v2140_v36, 4  ;;  %v1561_v41 = vcombine.low %v1553_v33, %v1560_v26  ;;  %v2802_v42 = vcombine.low %v1576_v34, %v1583_v32  ;;  %v2147_v43 = vsel %vm1964_vm0, %v1460_v20, -inf }
  0x2f   :  { %v2154_v44 = vsel %vm1964_vm0, %v1483_v24, -inf  ;;  %v2135_v45 = vmax.f32 %v2133_v35, %v2134_v39  ;;  %v2148_v48 = vrot.slane %v2147_v43, 4  ;;  %v2161_v53 = vsel %vm1964_vm0, %v1506_v28, -inf }
  0x30   :  { %v2142_v46 = vmax.f32 %v2140_v36, %v2141_v40  ;;  %v2155_v49 = vrot.slane %v2154_v44, 4  ;;  %v1568_v52 = vrot.slane %v1561_v41, %v2729_v5  ;;  %v2168_v54 = vsel %vm1964_vm0, %v1522_v37, -inf  ;;  %v34_v41 = vld [vmem:[#allocation2 + $0x60] sm:$0xff] }
  0x31   :  { %v2175_v55 = vsel %vm1964_vm0, %v1545_v38, -inf  ;;  %v2136_v58 = vrot.slane %v2135_v45, 2  ;;  %v2149_v60 = vmax.f32 %v2147_v43, %v2148_v48  ;;  %v2162_v62 = vrot.slane %v2161_v53, 4 }
  0x32   :  { %v2143_v59 = vrot.slane %v2142_v46, 2  ;;  %v2156_v61 = vmax.f32 %v2154_v44, %v2155_v49  ;;  %v2169_v63 = vrot.slane %v2168_v54, 4  ;;  %v2176_v2 = vrot.slane %v2175_v55, 4 }
  0x33   :  { %v2182_v4 = vsel %vm1964_vm0, %v1568_v52, -inf  ;;  %v2137_v6 = vmax.f32 %v2135_v45, %v2136_v58  ;;  %v2150_v8 = vrot.slane %v2149_v60, 2  ;;  %v2163_v10 = vmax.f32 %v2161_v53, %v2162_v62 }
  0x34   :  { %v2144_v7 = vmax.f32 %v2142_v46, %v2143_v59  ;;  %v2157_v9 = vrot.slane %v2156_v61, 2  ;;  %v2170_v11 = vmax.f32 %v2168_v54, %v2169_v63  ;;  %v2177_v12 = vmax.f32 %v2175_v55, %v2176_v2 }
  0x35   :  { %v2183_v13 = vrot.slane %v2182_v4, 4  ;;  %v2138_v14 = vrot.slane %v2137_v6, 1  ;;  %v2151_v17 = vmax.f32 %v2149_v60, %v2150_v8  ;;  %v2164_v19 = vrot.slane %v2163_v10, 2 }
  0x36   :  { %v2145_v15 = vrot.slane %v2144_v7, 1  ;;  %v2158_v18 = vmax.f32 %v2156_v61, %v2157_v9  ;;  %v2171_v20 = vrot.slane %v2170_v11, 2  ;;  %v2178_v21 = vrot.slane %v2177_v12, 2 }
  0x37   :  { %v2184_v22 = vmax.f32 %v2182_v4, %v2183_v13  ;;  %v2139_v23 = vmax.f32 %v2137_v6, %v2138_v14  ;;  %v2152_v25 = vrot.slane %v2151_v17, 1  ;;  %v2165_v27 = vmax.f32 %v2163_v10, %v2164_v19 }
  0x38   :  { %v2146_v24 = vmax.f32 %v2144_v7, %v2145_v15  ;;  %v2159_v26 = vrot.slane %v2158_v18, 1  ;;  %v2172_v28 = vmax.f32 %v2170_v11, %v2171_v20  ;;  %v2179_v29 = vmax.f32 %v2177_v12, %v2178_v21 }
  0x39   :  { %v2185_v30 = vrot.slane %v2184_v22, 2  ;;  %v2153_v32 = vmax.f32 %v2151_v17, %v2152_v25  ;;  %v630_v35 = vrot.slane %v616_v47, %v2729_v5  ;;  %v2166_v36 = vrot.slane %v2165_v27, 1  ;;  %v35_v47 = vld [vmem:[#allocation2 + $0x68] sm:$0xff] }
  0x3a   :  { %v2160_v33 = vmax.f32 %v2158_v18, %v2159_v26  ;;  %v2377_v34 = vsel %vm2349_vm1, %v2146_v24, %v2139_v23  ;;  %v2173_v37 = vrot.slane %v2172_v28, 1  ;;  %v2180_v38 = vrot.slane %v2179_v29, 1 }
  0x3b   :  { %v2186_v39 = vmax.f32 %v2184_v22, %v2185_v30  ;;  %v2378_v40 = vsel %vm2351_vm2, %v2153_v32, %v2377_v34  ;;  %v632_v43 = vcombine.high %v630_v35, %v630_v35  ;;  %v646_v44 = vrot.slane %v630_v35, %v2729_v5 }
  0x3c   :  { %v653_v45 = vrot.slane %v631_v56, %v2729_v5  ;;  %v2167_v46 = vmax.f32 %v2165_v27, %v2166_v36  ;;  %v2174_v48 = vmax.f32 %v2172_v28, %v2173_v37  ;;  %v2181_v49 = vmax.f32 %v2179_v29, %v2180_v38 }
  0x3d   :  { %v2187_v31 = vrot.slane %v2186_v39, 1  ;;  %v2379_v52 = vsel %vm2353_vm3, %v2160_v33, %v2378_v40  ;;  %v660_v53 = vrot.slane %v632_v43, %v2729_v5  ;;  %v662_v54 = vcombine.high %v646_v44, %v646_v44 }
  0x3e   :  { %v663_v55 = vcombine.high %v653_v45, %v653_v45  ;;  %v2380_v59 = vsel %vm2355_vm4, %v2167_v46, %v2379_v52  ;;  %v665_v60 = vcombine.high %v34_v41, %v34_v41  ;;  %v672_v61 = vrot.slane %v34_v41, %v2729_v5 }
  0x3f   :  { %v2188_v58 = vmax.f32 %v2186_v39, %v2187_v31  ;;  %v2381_v50 = vsel %vm2357_vm5, %v2174_v48, %v2380_v59  ;;  %v664_v56 = vcombine.high %v660_v53, %v660_v53  ;;  %v714_v62 = vcombine.high %v35_v47, %v35_v47 }
  0x40   :  { %v721_v63 = vrot.slane %v35_v47, %v2729_v5  ;;  %v2382_v2 = vsel %vm2359_vm6, %v2181_v49, %v2381_v50  ;;  %v679_v4 = vrot.slane %v665_v60, %v2729_v5  ;;  %v680_v6 = vcombine.high %v672_v61, %v672_v61 }
  0x41   :  { %v688_v7 = vrot.slane %v672_v61, %v2729_v5  ;;  %v2383_v8 = vsel %vm2361_vm7, %v2188_v58, %v2382_v2  ;;  %v728_v9 = vrot.slane %v714_v62, %v2729_v5  ;;  %v1591_v26 = vrot.slane %v2802_v42, %v2729_v5 }
  0x42   :  { %v729_v10 = vcombine.high %v721_v63, %v721_v63  ;;  %v737_v11 = vrot.slane %v721_v63, %v2729_v5  ;;  %v2835_v12 = vsel %vm2404_vm8, %v2383_v8, -3.4028235e+38  ;;  %v681_v13 = vcombine.high %v679_v4, %v679_v4 }
  0x43   :  { %v695_v14 = vrot.slane %v679_v4, %v2729_v5  ;;  %v702_v15 = vrot.slane %v680_v6, %v2729_v5  ;;  %2447 = vrot.lane.b32.xlu1 %v2835_v12, %s2700_s0  ;;  %2423 = vrot.lane.b32.xlu0 %v2835_v12, %s2701_s20  ;;  %v710_v17 = vcombine.high %v688_v7, %v688_v7  ;;  %v2189_v62 = vsel %vm1964_vm0, %v1591_v26, -inf }
  0x44   :  { %v730_v18 = vcombine.high %v728_v9, %v728_v9  ;;  %v2844_v19 = vrot.slane %v728_v9, %v2729_v5  ;;  %v709_v20 = vrot.slane %v681_v13, %v2729_v5  ;;  %v751_v22 = vrot.slane %v729_v10, %v2729_v5 }
  0x45   :  { %v712_v21 = vcombine.high %v702_v15, %v702_v15  ;;  %v759_v23 = vcombine.high %v737_v11, %v737_v11  ;;  %v1592_v27 = vcombine.low %v653_v45, %v661_v1  ;;  %v1606_v29 = vrot.slane %v663_v55, %v2729_v5 }
  0x46   :  { %v2849_v24 = vrot.slane %v730_v18, %v2729_v5  ;;  %v760_v25 = vcombine.high %v2844_v19, %v2844_v19  ;;  %v761_v28 = vcombine.high %v751_v22, %v751_v22  ;;  %v1615_v30 = vcombine.low %v646_v44, %v660_v53 }
  0x47   :  { %v1629_v32 = vrot.slane %v662_v54, %v2729_v5  ;;  %v1599_v34 = vrot.slane %v1592_v27, %v2729_v5  ;;  %v1638_v35 = vcombine.low %v664_v56, %v2735_v16  ;;  %v1654_v36 = vcombine.low %v688_v7, %v702_v15 }
  0x48   :  { %v762_v33 = vcombine.high %v2849_v24, %v2849_v24  ;;  %v1622_v42 = vrot.slane %v1615_v30, %v2729_v5  ;;  %v1668_v37 = vrot.slane %v710_v17, %v2729_v5  ;;  %v1677_v57 = vcombine.low %v712_v21, %v695_v14 }
  0x49   :  { %v1691_v1 = vrot.slane %v709_v20, %v2729_v5  ;;  %v1607_v38 = vcombine.low %v1599_v34, %v1606_v29  ;;  %v1645_v39 = vrot.slane %v1638_v35, %v2729_v5  ;;  %v1661_v40 = vrot.slane %v1654_v36, %v2729_v5 }
  0x4a   :  { %v2608_v41 = vcombine.high %v695_v14, %v709_v20  ;;  %v1630_v43 = vcombine.low %v1622_v42, %v1629_v32  ;;  %v1684_v44 = vrot.slane %v1677_v57, %v2729_v5  ;;  %v1714_v45 = vrot.slane %v737_v11, %v2729_v5 }
  0x4b   :  { %v1723_v46 = vcombine.low %v751_v22, %v759_v23  ;;  %v1614_v48 = vrot.slane %v1607_v38, %v2729_v5  ;;  %v1646_v49 = vcombine.low %v1645_v39, %v2763_v51  ;;  %v1669_v31 = vcombine.low %v1661_v40, %v1668_v37 }
  0x4c   :  { %v1707_v47 = vrot.slane %v2608_v41, %v2729_v5  ;;  %v1637_v52 = vrot.slane %v1630_v43, %v2729_v5  ;;  %v1692_v53 = vcombine.low %v1684_v44, %v1691_v1  ;;  %v1737_v55 = vrot.slane %v761_v28, %v2729_v5 }
  0x4d   :  { %v1730_v54 = vrot.slane %v1723_v46, %v2729_v5  ;;  %v1653_v58 = vrot.slane %v1646_v49, %v2729_v5  ;;  %v1676_v59 = vrot.slane %v1669_v31, %v2729_v5  ;;  %v1746_v61 = vcombine.low %v2844_v19, %v2849_v24  ;;  %v22_v31 = vld [vmem:[#allocation2] sm:$0xff] }
  0x4e   :  { %v1715_v60 = vcombine.low %v1707_v47, %v1714_v45  ;;  %v1699_v50 = vrot.slane %v1692_v53, %v2729_v5  ;;  %v2196_v63 = vsel %vm1964_vm0, %v1614_v48, -inf  ;;  %v2190_v4 = vrot.slane %v2189_v62, 4 }
  0x4f   :  { %v1738_v56 = vcombine.low %v1730_v54, %v1737_v55  ;;  %v2197_v6 = vrot.slane %v2196_v63, 4  ;;  %v2203_v7 = vsel %vm1964_vm0, %v1637_v52, -inf  ;;  %v2210_v10 = vsel %vm1964_vm0, %v1653_v58, -inf }
  0x50   :  { %v1722_v2 = vrot.slane %v1715_v60, %v2729_v5  ;;  %v2204_v9 = vrot.slane %v2203_v7, 4  ;;  %v2217_v11 = vsel %vm1964_vm0, %v1676_v59, -inf  ;;  %v2191_v13 = vmax.f32 %v2189_v62, %v2190_v4 }
  0x51   :  { %v1745_v8 = vrot.slane %v1738_v56, %v2729_v5  ;;  %v2198_v14 = vmax.f32 %v2196_v63, %v2197_v6  ;;  %v2211_v15 = vrot.slane %v2210_v10, 4  ;;  %v2218_v17 = vrot.slane %v2217_v11, 4 }
  0x52   :  { %v2205_v18 = vmax.f32 %v2203_v7, %v2204_v9  ;;  %v2224_v20 = vsel %vm1964_vm0, %v1699_v50, -inf  ;;  %v2231_v21 = vsel %vm1964_vm0, %v1722_v2, -inf  ;;  %v2192_v23 = vrot.slane %v2191_v13, 2  ;;  %v23_v50 = vld [vmem:[#allocation2 + $0x8] sm:$0xff] }
  0x53   :  { %v2238_v22 = vsel %vm1964_vm0, %v1745_v8, -inf  ;;  %v2199_v26 = vrot.slane %v2198_v14, 2  ;;  %v2212_v27 = vmax.f32 %v2210_v10, %v2211_v15  ;;  %v2219_v28 = vmax.f32 %v2217_v11, %v2218_v17  ;;  %v24_v10 = vld [vmem:[#allocation2 + $0x10] sm:$0xff] }
  0x54   :  { %v2206_v29 = vrot.slane %v2205_v18, 2  ;;  %v2225_v30 = vrot.slane %v2224_v20, 4  ;;  %v2232_v32 = vrot.slane %v2231_v21, 4  ;;  %v2239_v34 = vrot.slane %v2238_v22, 4 }
  0x55   :  { %v2193_v35 = vmax.f32 %v2191_v13, %v2192_v23  ;;  %v2200_v36 = vmax.f32 %v2198_v14, %v2199_v26  ;;  %v2213_v42 = vrot.slane %v2212_v27, 2  ;;  %v2220_v37 = vrot.slane %v2219_v28, 2 }
  0x56   :  { %v2207_v57 = vmax.f32 %v2205_v18, %v2206_v29  ;;  %v2226_v1 = vmax.f32 %v2224_v20, %v2225_v30  ;;  %v2233_v38 = vmax.f32 %v2231_v21, %v2232_v32  ;;  %v2240_v39 = vmax.f32 %v2238_v22, %v2239_v34 }
  0x57   :  { %v2194_v40 = vrot.slane %v2193_v35, 1  ;;  %v2201_v41 = vrot.slane %v2200_v36, 1  ;;  %v2214_v43 = vmax.f32 %v2212_v27, %v2213_v42  ;;  %v2221_v44 = vmax.f32 %v2219_v28, %v2220_v37  ;;  %v2907_v37 = vld [vmem:[#allocation2 + $0x18] sm:$0xff] }
  0x58   :  { %v2208_v45 = vrot.slane %v2207_v57, 1  ;;  %v2227_v46 = vrot.slane %v2226_v1, 2  ;;  %v2234_v48 = vrot.slane %v2233_v38, 2  ;;  %v2241_v49 = vrot.slane %v2240_v39, 2 }
  0x59   :  { %v2195_v47 = vmax.f32 %v2193_v35, %v2194_v40  ;;  %v2202_v52 = vmax.f32 %v2200_v36, %v2201_v41  ;;  %v2215_v53 = vrot.slane %v2214_v43, 1  ;;  %v2222_v54 = vrot.slane %v2221_v44, 1 }
  0x5a   :  { %v2209_v55 = vmax.f32 %v2207_v57, %v2208_v45  ;;  %v2228_v58 = vmax.f32 %v2226_v1, %v2227_v46  ;;  %v2235_v59 = vmax.f32 %v2233_v38, %v2234_v48  ;;  %v2242_v60 = vmax.f32 %v2240_v39, %v2241_v49 }
  0x5b   :  { %v2216_v56 = vmax.f32 %v2214_v43, %v2215_v53  ;;  %v2223_v62 = vmax.f32 %v2221_v44, %v2222_v54  ;;  %v2384_v63 = vsel %vm2349_vm1, %v2202_v52, %v2195_v47  ;;  %v55_v2 = vcombine.high %v22_v31, %v22_v31 }
  0x5c   :  { %v2229_v4 = vrot.slane %v2228_v58, 1  ;;  %v2236_v6 = vrot.slane %v2235_v59, 1  ;;  %v2243_v7 = vrot.slane %v2242_v60, 1  ;;  %v2385_v8 = vsel %vm2351_vm2, %v2209_v55, %v2384_v63 }
  0x5d   :  { %v2386_v9 = vsel %vm2353_vm3, %v2216_v56, %v2385_v8  ;;  %v62_v11 = vrot.slane %v22_v31, %v2729_v5  ;;  %v69_v13 = vrot.slane %v55_v2, %v2729_v5  ;;  %v104_v14 = vcombine.high %v23_v50, %v23_v50 }
  0x5e   :  { %v2230_v15 = vmax.f32 %v2228_v58, %v2229_v4  ;;  %v2237_v17 = vmax.f32 %v2235_v59, %v2236_v6  ;;  %v2244_v18 = vmax.f32 %v2242_v60, %v2243_v7  ;;  %v2387_v20 = vsel %vm2355_vm4, %v2223_v62, %v2386_v9 }
  0x5f   :  { %v70_v21 = vcombine.high %v62_v11, %v62_v11  ;;  %v71_v22 = vcombine.high %v69_v13, %v69_v13  ;;  %v78_v23 = vrot.slane %v62_v11, %v2729_v5  ;;  %v85_v26 = vrot.slane %v69_v13, %v2729_v5 }
  0x60   :  { %v2388_v27 = vsel %vm2357_vm5, %v2230_v15, %v2387_v20  ;;  %v111_v28 = vrot.slane %v23_v50, %v2729_v5  ;;  %v118_v29 = vrot.slane %v104_v14, %v2729_v5  ;;  %v175_v30 = vcombine.high %v24_v10, %v24_v10 }
  0x61   :  { %v2389_v32 = vsel %vm2359_vm6, %v2237_v17, %v2388_v27  ;;  %v92_v34 = vrot.slane %v70_v21, %v2729_v5  ;;  %v99_v35 = vrot.slane %v71_v22, %v2729_v5  ;;  %v100_v36 = vcombine.high %v78_v23, %v78_v23 }
  0x62   :  { %v2390_v42 = vsel %vm2361_vm7, %v2244_v18, %v2389_v32  ;;  %v119_v57 = vcombine.high %v111_v28, %v111_v28  ;;  %v120_v1 = vcombine.high %v118_v29, %v118_v29  ;;  %v127_v38 = vrot.slane %v111_v28, %v2729_v5 }
  0x63   :  { %v2911_v39 = vsel %vm2404_vm8, %v2390_v42, -3.4028235e+38  ;;  %v102_v40 = vcombine.high %v92_v34, %v92_v34  ;;  %v134_v41 = vrot.slane %v118_v29, %v2729_v5  ;;  %v182_v43 = vrot.slane %v24_v10, %v2729_v5 }
  0x64   :  { %2425 = vrot.lane.b32.xlu1 %v2911_v39, %s2701_s20  ;;  %v141_v44 = vrot.slane %v119_v57, %v2729_v5  ;;  %v148_v45 = vrot.slane %v120_v1, %v2729_v5  ;;  %v149_v46 = vcombine.high %v127_v38, %v127_v38  ;;  %v189_v48 = vrot.slane %v175_v30, %v2729_v5 }
  0x65   :  { %v150_v49 = vcombine.high %v134_v41, %v134_v41  ;;  %v190_v31 = vcombine.high %v182_v43, %v182_v43  ;;  %v198_v47 = vrot.slane %v182_v43, %v2729_v5  ;;  %v224_v52 = vcombine.high %v2907_v37, %v2907_v37 }
  0x66   :  { %v151_v53 = vcombine.high %v141_v44, %v141_v44  ;;  %v152_v54 = vcombine.high %v148_v45, %v148_v45  ;;  %v191_v55 = vcombine.high %v189_v48, %v189_v48  ;;  %v205_v58 = vrot.slane %v189_v48, %v2729_v5 }
  0x67   :  { %v212_v59 = vrot.slane %v190_v31, %v2729_v5  ;;  %v220_v60 = vcombine.high %v198_v47, %v198_v47  ;;  %v2927_v50 = vrot.slane %v2907_v37, %v2729_v5  ;;  %v861_v56 = vcombine.low %v78_v23, %v92_v34 }
  0x68   :  { %v219_v62 = vrot.slane %v191_v55, %v2729_v5  ;;  %v875_v63 = vrot.slane %v100_v36, %v2729_v5  ;;  %v884_v2 = vcombine.low %v102_v40, %v85_v26  ;;  %v898_v4 = vrot.slane %v99_v35, %v2729_v5  ;;  %2449 = vrot.lane.b32.xlu1 %v2911_v39, %s2700_s0 }
  0x69   :  { %v222_v6 = vcombine.high %v212_v59, %v212_v59  ;;  %v239_v7 = vcombine.high %v2927_v50, %v2927_v50  ;;  %v2938_v8 = vrot.slane %v2927_v50, %v2729_v5  ;;  %v868_v9 = vrot.slane %v861_v56, %v2729_v5 }
  0x6a   :  { %v891_v10 = vrot.slane %v884_v2, %v2729_v5  ;;  %v2602_v11 = vcombine.high %v85_v26, %v99_v35  ;;  %v921_v13 = vrot.slane %v127_v38, %v2729_v5  ;;  %v930_v14 = vcombine.low %v141_v44, %v149_v46 }
  0x6b   :  { %v269_v15 = vcombine.high %v2938_v8, %v2938_v8  ;;  %v876_v17 = vcombine.low %v868_v9, %v875_v63  ;;  %v944_v18 = vrot.slane %v151_v53, %v2729_v5  ;;  %v953_v20 = vcombine.low %v134_v41, %v148_v45 }
  0x6c   :  { %v899_v21 = vcombine.low %v891_v10, %v898_v4  ;;  %v914_v22 = vrot.slane %v2602_v11, %v2729_v5  ;;  %v937_v23 = vrot.slane %v930_v14, %v2729_v5  ;;  %v967_v27 = vrot.slane %v150_v49, %v2729_v5 }
  0x6d   :  { %v883_v28 = vrot.slane %v876_v17, %v2729_v5  ;;  %v960_v26 = vrot.slane %v953_v20, %v2729_v5  ;;  %v976_v29 = vcombine.low %v152_v54, %v2735_v16  ;;  %v999_v30 = vcombine.low %v198_v47, %v212_v59 }
  0x6e   :  { %v906_v32 = vrot.slane %v899_v21, %v2729_v5  ;;  %v922_v34 = vcombine.low %v914_v22, %v921_v13  ;;  %v945_v35 = vcombine.low %v937_v23, %v944_v18  ;;  %v1013_v36 = vrot.slane %v220_v60, %v2729_v5 }
  0x6f   :  { %v968_v42 = vcombine.low %v960_v26, %v967_v27  ;;  %v983_v57 = vrot.slane %v976_v29, %v2729_v5  ;;  %v1006_v1 = vrot.slane %v999_v30, %v2729_v5  ;;  %v1022_v38 = vcombine.low %v222_v6, %v205_v58 }
  0x70   :  { %v929_v40 = vrot.slane %v922_v34, %v2729_v5  ;;  %v952_v41 = vrot.slane %v945_v35, %v2729_v5  ;;  %v1036_v43 = vrot.slane %v219_v62, %v2729_v5  ;;  %v2603_v44 = vcombine.high %v205_v58, %v219_v62 }
  0x71   :  { %v975_v45 = vrot.slane %v968_v42, %v2729_v5  ;;  %v991_v46 = vcombine.low %v983_v57, %v2763_v51  ;;  %v1014_v48 = vcombine.low %v1006_v1, %v1013_v36  ;;  %v1029_v49 = vrot.slane %v1022_v38, %v2729_v5 }
  0x72   :  { %v1052_v31 = vrot.slane %v2603_v44, %v2729_v5  ;;  %v1059_v47 = vrot.slane %v2938_v8, %v2729_v5  ;;  %v1965_v53 = vsel %vm1964_vm0, %v883_v28, -inf  ;;  %v1972_v54 = vsel %vm1964_vm0, %v906_v32, -inf }
  0x73   :  { %v998_v55 = vrot.slane %v991_v46, %v2729_v5  ;;  %v1021_v58 = vrot.slane %v1014_v48, %v2729_v5  ;;  %v1037_v59 = vcombine.low %v1029_v49, %v1036_v43  ;;  %v1966_v60 = vrot.slane %v1965_v53, 4 }
  0x74   :  { %v2969_v56 = vcombine.low %v1052_v31, %v1059_v47  ;;  %v1973_v62 = vrot.slane %v1972_v54, 4  ;;  %v1979_v63 = vsel %vm1964_vm0, %v929_v40, -inf  ;;  %v1986_v2 = vsel %vm1964_vm0, %v952_v41, -inf }
  0x75   :  { %v1044_v4 = vrot.slane %v1037_v59, %v2729_v5  ;;  %v1967_v6 = vmax.f32 %v1965_v53, %v1966_v60  ;;  %v1980_v9 = vrot.slane %v1979_v63, 4  ;;  %v1987_v10 = vrot.slane %v1986_v2, 4 }
  0x76   :  { %v1974_v11 = vmax.f32 %v1972_v54, %v1973_v62  ;;  %v1993_v13 = vsel %vm1964_vm0, %v975_v45, -inf  ;;  %v2000_v14 = vsel %vm1964_vm0, %v998_v55, -inf  ;;  %v2007_v17 = vsel %vm1964_vm0, %v1021_v58, -inf }
  0x77   :  { %v1968_v18 = vrot.slane %v1967_v6, 2  ;;  %v1981_v20 = vmax.f32 %v1979_v63, %v1980_v9  ;;  %v1988_v21 = vmax.f32 %v1986_v2, %v1987_v10  ;;  %v1994_v22 = vrot.slane %v1993_v13, 4 }
  0x78   :  { %v1975_v23 = vrot.slane %v1974_v11, 2  ;;  %v2001_v27 = vrot.slane %v2000_v14, 4  ;;  %v2008_v28 = vrot.slane %v2007_v17, 4  ;;  %v2014_v26 = vsel %vm1964_vm0, %v1044_v4, -inf }
  0x79   :  { %v1969_v29 = vmax.f32 %v1967_v6, %v1968_v18  ;;  %v1982_v30 = vrot.slane %v1981_v20, 2  ;;  %v1989_v32 = vrot.slane %v1988_v21, 2  ;;  %v1995_v34 = vmax.f32 %v1993_v13, %v1994_v22  ;;  %v26_v13 = vld [vmem:[#allocation2 + $0x20] sm:$0xff] }
  0x7a   :  { %v1976_v35 = vmax.f32 %v1974_v11, %v1975_v23  ;;  %v2002_v36 = vmax.f32 %v2000_v14, %v2001_v27  ;;  %v2009_v42 = vmax.f32 %v2007_v17, %v2008_v28  ;;  %v2015_v57 = vrot.slane %v2014_v26, 4  ;;  %v27_v23 = vld [vmem:[#allocation2 + $0x28] sm:$0xff] }
  0x7b   :  { %v1970_v1 = vrot.slane %v1969_v29, 1  ;;  %v1983_v38 = vmax.f32 %v1981_v20, %v1982_v30  ;;  %v1990_v40 = vmax.f32 %v1988_v21, %v1989_v32  ;;  %v1996_v41 = vrot.slane %v1995_v34, 2 }
  0x7c   :  { %v1977_v43 = vrot.slane %v1976_v35, 1  ;;  %v2003_v44 = vrot.slane %v2002_v36, 2  ;;  %v2010_v45 = vrot.slane %v2009_v42, 2  ;;  %v2016_v46 = vmax.f32 %v2014_v26, %v2015_v57 }
  0x7d   :  { %v1971_v48 = vmax.f32 %v1969_v29, %v1970_v1  ;;  %v1984_v49 = vrot.slane %v1983_v38, 1  ;;  %v1991_v31 = vrot.slane %v1990_v40, 1  ;;  %v1997_v47 = vmax.f32 %v1995_v34, %v1996_v41 }
  0x7e   :  { %v1978_v53 = vmax.f32 %v1976_v35, %v1977_v43  ;;  %v2004_v54 = vmax.f32 %v2002_v36, %v2003_v44  ;;  %v2011_v55 = vmax.f32 %v2009_v42, %v2010_v45  ;;  %v2017_v58 = vrot.slane %v2016_v46, 2 }
  0x7f   :  { %v1985_v59 = vmax.f32 %v1983_v38, %v1984_v49  ;;  %v1992_v60 = vmax.f32 %v1990_v40, %v1991_v31  ;;  %v1998_v62 = vrot.slane %v1997_v47, 1  ;;  %v238_v63 = vrot.slane %v224_v52, %v2729_v5 }
  0x80   :  { %v2005_v2 = vrot.slane %v2004_v54, 1  ;;  %v2012_v4 = vrot.slane %v2011_v55, 1  ;;  %v2018_v6 = vmax.f32 %v2016_v46, %v2017_v58  ;;  %v2350_v9 = vsel %vm2349_vm1, %v1978_v53, %v1971_v48 }
  0x81   :  { %v1999_v10 = vmax.f32 %v1997_v47, %v1998_v62  ;;  %v2352_v11 = vsel %vm2351_vm2, %v1985_v59, %v2350_v9  ;;  %v240_v14 = vcombine.high %v238_v63, %v238_v63  ;;  %v254_v17 = vrot.slane %v238_v63, %v2729_v5 }
  0x82   :  { %v2006_v18 = vmax.f32 %v2004_v54, %v2005_v2  ;;  %v2013_v20 = vmax.f32 %v2011_v55, %v2012_v4  ;;  %v2019_v21 = vrot.slane %v2018_v6, 1  ;;  %v2354_v22 = vsel %vm2353_vm3, %v1992_v60, %v2352_v11 }
  0x83   :  { %v2356_v37 = vsel %vm2355_vm4, %v1999_v10, %v2354_v22  ;;  %v261_v52 = vrot.slane %v239_v7, %v2729_v5  ;;  %v268_v27 = vrot.slane %v240_v14, %v2729_v5  ;;  %v270_v28 = vcombine.high %v254_v17, %v254_v17 }
  0x84   :  { %v2020_v26 = vmax.f32 %v2018_v6, %v2019_v21  ;;  %v2358_v29 = vsel %vm2357_vm5, %v2006_v18, %v2356_v37  ;;  %v273_v30 = vcombine.high %v26_v13, %v26_v13  ;;  %v280_v32 = vrot.slane %v26_v13, %v2729_v5 }
  0x85   :  { %v2360_v34 = vsel %vm2359_vm6, %v2013_v20, %v2358_v29  ;;  %v271_v35 = vcombine.high %v261_v52, %v261_v52  ;;  %v272_v36 = vcombine.high %v268_v27, %v268_v27  ;;  %v322_v42 = vcombine.high %v27_v23, %v27_v23 }
  0x86   :  { %v2362_v57 = vsel %vm2361_vm7, %v2020_v26, %v2360_v34  ;;  %v287_v1 = vrot.slane %v273_v30, %v2729_v5  ;;  %v288_v50 = vcombine.high %v280_v32, %v280_v32  ;;  %v296_v7 = vrot.slane %v280_v32, %v2729_v5 }
  0x87   :  { %v2999_v38 = vsel %vm2404_vm8, %v2362_v57, -3.4028235e+38  ;;  %v329_v40 = vrot.slane %v27_v23, %v2729_v5  ;;  %v336_v41 = vrot.slane %v322_v42, %v2729_v5  ;;  %v1067_v43 = vrot.slane %v2969_v56, %v2729_v5 }
  0x88   :  { %2417 = vrot.lane.b32.xlu0 %v2999_v38, %s2701_s20  ;;  %v289_v44 = vcombine.high %v287_v1, %v287_v1  ;;  %v303_v45 = vrot.slane %v287_v1, %v2729_v5  ;;  %v310_v46 = vrot.slane %v288_v50, %v2729_v5  ;;  %v318_v48 = vcombine.high %v296_v7, %v296_v7 }
  0x89   :  { %v337_v49 = vcombine.high %v329_v40, %v329_v40  ;;  %v338_v31 = vcombine.high %v336_v41, %v336_v41  ;;  %v345_v47 = vrot.slane %v329_v40, %v2729_v5  ;;  %v3011_v53 = vrot.slane %v336_v41, %v2729_v5 }
  0x8a   :  { %v317_v54 = vrot.slane %v289_v44, %v2729_v5  ;;  %v320_v55 = vcombine.high %v310_v46, %v310_v46  ;;  %v1068_v56 = vcombine.low %v261_v52, %v269_v15  ;;  %v1082_v58 = vrot.slane %v271_v35, %v2729_v5 }
  0x8b   :  { %v359_v59 = vrot.slane %v337_v49, %v2729_v5  ;;  %v3020_v60 = vrot.slane %v338_v31, %v2729_v5  ;;  %v367_v62 = vcombine.high %v345_v47, %v345_v47  ;;  %v368_v63 = vcombine.high %v3011_v53, %v3011_v53 }
  0x8c   :  { %v1075_v2 = vrot.slane %v1068_v56, %v2729_v5  ;;  %v1091_v4 = vcombine.low %v254_v17, %v268_v27  ;;  %v1105_v6 = vrot.slane %v270_v28, %v2729_v5  ;;  %v1114_v9 = vcombine.low %v272_v36, %v2735_v16 }
  0x8d   :  { %v369_v8 = vcombine.high %v359_v59, %v359_v59  ;;  %v370_v15 = vcombine.high %v3020_v60, %v3020_v60  ;;  %v1130_v10 = vcombine.low %v296_v7, %v310_v46  ;;  %v1144_v11 = vrot.slane %v318_v48, %v2729_v5 }
  0x8e   :  { %v1083_v13 = vcombine.low %v1075_v2, %v1082_v58  ;;  %v1098_v14 = vrot.slane %v1091_v4, %v2729_v5  ;;  %v1121_v18 = vrot.slane %v1114_v9, %v2729_v5  ;;  %v1153_v20 = vcombine.low %v320_v55, %v303_v45 }
  0x8f   :  { %v1137_v21 = vrot.slane %v1130_v10, %v2729_v5  ;;  %v1167_v17 = vrot.slane %v317_v54, %v2729_v5  ;;  %v2604_v22 = vcombine.high %v303_v45, %v317_v54  ;;  %v1190_v23 = vrot.slane %v345_v47, %v2729_v5 }
  0x90   :  { %v1090_v37 = vrot.slane %v1083_v13, %v2729_v5  ;;  %v1106_v52 = vcombine.low %v1098_v14, %v1105_v6  ;;  %v1122_v27 = vcombine.low %v1121_v18, %v2763_v51  ;;  %v1160_v28 = vrot.slane %v1153_v20, %v2729_v5 }
  0x91   :  { %v1145_v26 = vcombine.low %v1137_v21, %v1144_v11  ;;  %v1183_v29 = vrot.slane %v2604_v22, %v2729_v5  ;;  %v1199_v30 = vcombine.low %v359_v59, %v367_v62  ;;  %v1213_v32 = vrot.slane %v369_v8, %v2729_v5 }
  0x92   :  { %v1113_v34 = vrot.slane %v1106_v52, %v2729_v5  ;;  %v1129_v35 = vrot.slane %v1122_v27, %v2729_v5  ;;  %v1168_v36 = vcombine.low %v1160_v28, %v1167_v17  ;;  %v1222_v42 = vcombine.low %v3011_v53, %v3020_v60 }
  0x93   :  { %v1152_v57 = vrot.slane %v1145_v26, %v2729_v5  ;;  %v1191_v1 = vcombine.low %v1183_v29, %v1190_v23  ;;  %v1206_v50 = vrot.slane %v1199_v30, %v2729_v5  ;;  %v2021_v7 = vsel %vm1964_vm0, %v1067_v43, -inf }
  0x94   :  { %v1175_v40 = vrot.slane %v1168_v36, %v2729_v5  ;;  %v2022_v41 = vrot.slane %v2021_v7, 4  ;;  %v2028_v44 = vsel %vm1964_vm0, %v1090_v37, -inf  ;;  %v2035_v45 = vsel %vm1964_vm0, %v1113_v34, -inf }
  0x95   :  { %v1198_v46 = vrot.slane %v1191_v1, %v2729_v5  ;;  %v1214_v48 = vcombine.low %v1206_v50, %v1213_v32  ;;  %v2029_v49 = vrot.slane %v2028_v44, 4  ;;  %v2036_v31 = vrot.slane %v2035_v45, 4 }
  0x96   :  { %v2023_v47 = vmax.f32 %v2021_v7, %v2022_v41  ;;  %v2042_v54 = vsel %vm1964_vm0, %v1129_v35, -inf  ;;  %v2049_v55 = vsel %vm1964_vm0, %v1152_v57, -inf  ;;  %v2056_v56 = vsel %vm1964_vm0, %v1175_v40, -inf  ;;  %v28_v35 = vld [vmem:[#allocation2 + $0x30] sm:$0xff] }
  0x97   :  { %v1221_v43 = vrot.slane %v1214_v48, %v2729_v5  ;;  %v2030_v58 = vmax.f32 %v2028_v44, %v2029_v49  ;;  %v2037_v59 = vmax.f32 %v2035_v45, %v2036_v31  ;;  %v2043_v62 = vrot.slane %v2042_v54, 4 }
  0x98   :  { %v2024_v2 = vrot.slane %v2023_v47, 2  ;;  %v2050_v4 = vrot.slane %v2049_v55, 4  ;;  %v2057_v6 = vrot.slane %v2056_v56, 4  ;;  %v2063_v9 = vsel %vm1964_vm0, %v1198_v46, -inf }
  0x99   :  { %v2031_v8 = vrot.slane %v2030_v58, 2  ;;  %v2038_v10 = vrot.slane %v2037_v59, 2  ;;  %v2044_v11 = vmax.f32 %v2042_v54, %v2043_v62  ;;  %v2064_v13 = vrot.slane %v2063_v9, 4 }
  0x9a   :  { %v2025_v14 = vmax.f32 %v2023_v47, %v2024_v2  ;;  %v2051_v18 = vmax.f32 %v2049_v55, %v2050_v4  ;;  %v2058_v20 = vmax.f32 %v2056_v56, %v2057_v6  ;;  %v2070_v21 = vsel %vm1964_vm0, %v1221_v43, -inf  ;;  %v29_v55 = vld [vmem:[#allocation2 + $0x38] sm:$0xff] }
  0x9b   :  { %v2032_v17 = vmax.f32 %v2030_v58, %v2031_v8  ;;  %v2039_v22 = vmax.f32 %v2037_v59, %v2038_v10  ;;  %v2045_v23 = vrot.slane %v2044_v11, 2  ;;  %v2065_v37 = vmax.f32 %v2063_v9, %v2064_v13 }
  0x9c   :  { %v2026_v52 = vrot.slane %v2025_v14, 1  ;;  %v2052_v27 = vrot.slane %v2051_v18, 2  ;;  %v2059_v28 = vrot.slane %v2058_v20, 2  ;;  %v2071_v26 = vrot.slane %v2070_v21, 4 }
  0x9d   :  { %v2033_v29 = vrot.slane %v2032_v17, 1  ;;  %v2040_v30 = vrot.slane %v2039_v22, 1  ;;  %v2046_v32 = vmax.f32 %v2044_v11, %v2045_v23  ;;  %v2066_v34 = vrot.slane %v2065_v37, 2 }
  0x9e   :  { %v2027_v36 = vmax.f32 %v2025_v14, %v2026_v52  ;;  %v2053_v57 = vmax.f32 %v2051_v18, %v2052_v27  ;;  %v2060_v1 = vmax.f32 %v2058_v20, %v2059_v28  ;;  %v2072_v50 = vmax.f32 %v2070_v21, %v2071_v26 }
  0x9f   :  { %v2034_v7 = vmax.f32 %v2032_v17, %v2033_v29  ;;  %v2041_v40 = vmax.f32 %v2039_v22, %v2040_v30  ;;  %v2047_v41 = vrot.slane %v2046_v32, 1  ;;  %v2067_v44 = vmax.f32 %v2065_v37, %v2066_v34 }
  0xa0   :  { %v2054_v45 = vrot.slane %v2053_v57, 1  ;;  %v2061_v46 = vrot.slane %v2060_v1, 1  ;;  %v2073_v48 = vrot.slane %v2072_v50, 2  ;;  %v371_v49 = vcombine.high %v28_v35, %v28_v35 }
  0xa1   :  { %v2048_v31 = vmax.f32 %v2046_v32, %v2047_v41  ;;  %v2068_v47 = vrot.slane %v2067_v44, 1  ;;  %v2363_v54 = vsel %vm2349_vm1, %v2034_v7, %v2027_v36  ;;  %v378_v56 = vrot.slane %v28_v35, %v2729_v5 }
  0xa2   :  { %v2055_v43 = vmax.f32 %v2053_v57, %v2054_v45  ;;  %v2062_v58 = vmax.f32 %v2060_v1, %v2061_v46  ;;  %v2074_v59 = vmax.f32 %v2072_v50, %v2073_v48  ;;  %v2364_v62 = vsel %vm2351_vm2, %v2041_v40, %v2363_v54 }
  0xa3   :  { %v2069_v2 = vmax.f32 %v2067_v44, %v2068_v47  ;;  %v2365_v4 = vsel %vm2353_vm3, %v2048_v31, %v2364_v62  ;;  %v385_v6 = vrot.slane %v371_v49, %v2729_v5  ;;  %v386_v9 = vcombine.high %v378_v56, %v378_v56 }
  0xa4   :  { %v2075_v8 = vrot.slane %v2074_v59, 1  ;;  %v2366_v10 = vsel %vm2355_vm4, %v2055_v43, %v2365_v4  ;;  %v394_v11 = vrot.slane %v378_v56, %v2729_v5  ;;  %v420_v13 = vcombine.high %v29_v55, %v29_v55 }
  0xa5   :  { %v2367_v14 = vsel %vm2357_vm5, %v2062_v58, %v2366_v10  ;;  %v387_v18 = vcombine.high %v385_v6, %v385_v6  ;;  %v401_v20 = vrot.slane %v385_v6, %v2729_v5  ;;  %v408_v21 = vrot.slane %v386_v9, %v2729_v5 }
  0xa6   :  { %v2076_v17 = vmax.f32 %v2074_v59, %v2075_v8  ;;  %v2368_v22 = vsel %vm2359_vm6, %v2069_v2, %v2367_v14  ;;  %v416_v23 = vcombine.high %v394_v11, %v394_v11  ;;  %v427_v37 = vrot.slane %v29_v55, %v2729_v5 }
  0xa7   :  { %v415_v52 = vrot.slane %v387_v18, %v2729_v5  ;;  %v418_v27 = vcombine.high %v408_v21, %v408_v21  ;;  %v434_v28 = vrot.slane %v420_v13, %v2729_v5  ;;  %v1229_v26 = vrot.slane %v1222_v42, %v2729_v5 }
  0xa8   :  { %v2369_v29 = vsel %vm2361_vm7, %v2076_v17, %v2368_v22  ;;  %v435_v30 = vcombine.high %v427_v37, %v427_v37  ;;  %v443_v32 = vrot.slane %v427_v37, %v2729_v5  ;;  %v1236_v34 = vrot.slane %v368_v63, %v2729_v5 }
  0xa9   :  { %v3082_v35 = vsel %vm2404_vm8, %v2369_v29, -3.4028235e+38  ;;  %v436_v36 = vcombine.high %v434_v28, %v434_v28  ;;  %v450_v57 = vrot.slane %v434_v28, %v2729_v5  ;;  %v1245_v42 = vcombine.low %v370_v15, %v2735_v16 }
  0xaa   :  { %2419 = vrot.lane.b32.xlu0 %v3082_v35, %s2701_s20  ;;  %v457_v1 = vrot.slane %v435_v30, %v2729_v5  ;;  %v465_v50 = vcombine.high %v443_v32, %v443_v32  ;;  %v1237_v7 = vcombine.low %v1229_v26, %v1236_v34  ;;  %v1261_v53 = vcombine.low %v394_v11, %v408_v21 }
  0xab   :  { %v464_v63 = vrot.slane %v436_v36, %v2729_v5  ;;  %v466_v40 = vcombine.high %v450_v57, %v450_v57  ;;  %v1252_v41 = vrot.slane %v1245_v42, %v2729_v5  ;;  %v1275_v44 = vrot.slane %v416_v23, %v2729_v5 }
  0xac   :  { %v467_v45 = vcombine.high %v457_v1, %v457_v1  ;;  %v1244_v46 = vrot.slane %v1237_v7, %v2729_v5  ;;  %v1268_v60 = vrot.slane %v1261_v53, %v2729_v5  ;;  %v1284_v15 = vcombine.low %v418_v27, %v401_v20 }
  0xad   :  { %v468_v48 = vcombine.high %v464_v63, %v464_v63  ;;  %v1253_v49 = vcombine.low %v1252_v41, %v2763_v51  ;;  %v1298_v31 = vrot.slane %v415_v52, %v2729_v5  ;;  %v2605_v47 = vcombine.high %v401_v20, %v415_v52 }
  0xae   :  { %v1276_v54 = vcombine.low %v1268_v60, %v1275_v44  ;;  %v1291_v55 = vrot.slane %v1284_v15, %v2729_v5  ;;  %v1321_v56 = vrot.slane %v443_v32, %v2729_v5  ;;  %v1330_v43 = vcombine.low %v457_v1, %v465_v50 }
  0xaf   :  { %v1260_v58 = vrot.slane %v1253_v49, %v2729_v5  ;;  %v1314_v59 = vrot.slane %v2605_v47, %v2729_v5  ;;  %v1344_v62 = vrot.slane %v467_v45, %v2729_v5  ;;  %v1353_v2 = vcombine.low %v450_v57, %v464_v63 }
  0xb0   :  { %v1283_v4 = vrot.slane %v1276_v54, %v2729_v5  ;;  %v1299_v6 = vcombine.low %v1291_v55, %v1298_v31  ;;  %v1337_v9 = vrot.slane %v1330_v43, %v2729_v5  ;;  %v1367_v8 = vrot.slane %v466_v40, %v2729_v5 }
  0xb1   :  { %v1322_v10 = vcombine.low %v1314_v59, %v1321_v56  ;;  %v1360_v11 = vrot.slane %v1353_v2, %v2729_v5  ;;  %v1376_v13 = vcombine.low %v468_v48, %v2735_v16  ;;  %v2077_v14 = vsel %vm1964_vm0, %v1244_v46, -inf }
  0xb2   :  { %v1306_v18 = vrot.slane %v1299_v6, %v2729_v5  ;;  %v1345_v20 = vcombine.low %v1337_v9, %v1344_v62  ;;  %v2078_v21 = vrot.slane %v2077_v14, 4  ;;  %v2084_v17 = vsel %vm1964_vm0, %v1260_v58, -inf  ;;  %v36_v62 = vld [vmem:[#allocation2 + $0x70] sm:$0xff] }
  0xb3   :  { %v1329_v22 = vrot.slane %v1322_v10, %v2729_v5  ;;  %v1368_v23 = vcombine.low %v1360_v11, %v1367_v8  ;;  %v1383_v37 = vrot.slane %v1376_v13, %v2729_v5  ;;  %v2085_v52 = vrot.slane %v2084_v17, 4 }
  0xb4   :  { %v1352_v27 = vrot.slane %v1345_v20, %v2729_v5  ;;  %v2079_v28 = vmax.f32 %v2077_v14, %v2078_v21  ;;  %v2091_v26 = vsel %vm1964_vm0, %v1283_v4, -inf  ;;  %v2098_v29 = vsel %vm1964_vm0, %v1306_v18, -inf }
  0xb5   :  { %v1375_v30 = vrot.slane %v1368_v23, %v2729_v5  ;;  %v1384_v32 = vcombine.low %v1383_v37, %v2763_v51  ;;  %v2086_v34 = vmax.f32 %v2084_v17, %v2085_v52  ;;  %v2092_v36 = vrot.slane %v2091_v26, 4 }
  0xb6   :  { %v2080_v57 = vrot.slane %v2079_v28, 2  ;;  %v2099_v42 = vrot.slane %v2098_v29, 4  ;;  %v2105_v1 = vsel %vm1964_vm0, %v1329_v22, -inf  ;;  %v2112_v50 = vsel %vm1964_vm0, %v1352_v27, -inf }
  0xb7   :  { %v1391_v7 = vrot.slane %v1384_v32, %v2729_v5  ;;  %v2087_v53 = vrot.slane %v2086_v34, 2  ;;  %v2093_v63 = vmax.f32 %v2091_v26, %v2092_v36  ;;  %v2106_v40 = vrot.slane %v2105_v1, 4 }
  0xb8   :  { %v2081_v41 = vmax.f32 %v2079_v28, %v2080_v57  ;;  %v2100_v44 = vmax.f32 %v2098_v29, %v2099_v42  ;;  %v2113_v45 = vrot.slane %v2112_v50, 4  ;;  %v2119_v46 = vsel %vm1964_vm0, %v1375_v30, -inf }
  0xb9   :  { %v2088_v60 = vmax.f32 %v2086_v34, %v2087_v53  ;;  %v2094_v15 = vrot.slane %v2093_v63, 2  ;;  %v2107_v48 = vmax.f32 %v2105_v1, %v2106_v40  ;;  %v2120_v49 = vrot.slane %v2119_v46, 4  ;;  %v37_v1 = vld [vmem:[#allocation2 + $0x78] sm:$0xff] }
  0xba   :  { %v2082_v31 = vrot.slane %v2081_v41, 1  ;;  %v2101_v47 = vrot.slane %v2100_v44, 2  ;;  %v2114_v54 = vmax.f32 %v2112_v50, %v2113_v45  ;;  %v2126_v55 = vsel %vm1964_vm0, %v1391_v7, -inf }
  0xbb   :  { %v2089_v56 = vrot.slane %v2088_v60, 1  ;;  %v2095_v43 = vmax.f32 %v2093_v63, %v2094_v15  ;;  %v2108_v58 = vrot.slane %v2107_v48, 2  ;;  %v2121_v59 = vmax.f32 %v2119_v46, %v2120_v49 }
  0xbc   :  { %v2083_v2 = vmax.f32 %v2081_v41, %v2082_v31  ;;  %v2102_v4 = vmax.f32 %v2100_v44, %v2101_v47  ;;  %v2115_v6 = vrot.slane %v2114_v54, 2  ;;  %v2127_v9 = vrot.slane %v2126_v55, 4 }
  0xbd   :  { %v2090_v8 = vmax.f32 %v2088_v60, %v2089_v56  ;;  %v2096_v10 = vrot.slane %v2095_v43, 1  ;;  %v2109_v11 = vmax.f32 %v2107_v48, %v2108_v58  ;;  %v2122_v13 = vrot.slane %v2121_v59, 2 }
  0xbe   :  { %v2103_v14 = vrot.slane %v2102_v4, 1  ;;  %v2116_v18 = vmax.f32 %v2114_v54, %v2115_v6  ;;  %v2128_v20 = vmax.f32 %v2126_v55, %v2127_v9  ;;  %v763_v21 = vcombine.high %v36_v62, %v36_v62 }
  0xbf   :  { %v2097_v17 = vmax.f32 %v2095_v43, %v2096_v10  ;;  %v2110_v22 = vrot.slane %v2109_v11, 1  ;;  %v2123_v23 = vmax.f32 %v2121_v59, %v2122_v13  ;;  %v2370_v37 = vsel %vm2349_vm1, %v2090_v8, %v2083_v2 }
  0xc0   :  { %v2104_v52 = vmax.f32 %v2102_v4, %v2103_v14  ;;  %v2117_v27 = vrot.slane %v2116_v18, 1  ;;  %v2129_v28 = vrot.slane %v2128_v20, 2  ;;  %v770_v26 = vrot.slane %v36_v62, %v2729_v5 }
  0xc1   :  { %v2111_v29 = vmax.f32 %v2109_v11, %v2110_v22  ;;  %v2124_v30 = vrot.slane %v2123_v23, 1  ;;  %v2371_v32 = vsel %vm2351_vm2, %v2097_v17, %v2370_v37  ;;  %v777_v34 = vrot.slane %v763_v21, %v2729_v5 }
  0xc2   :  { %v2118_v36 = vmax.f32 %v2116_v18, %v2117_v27  ;;  %v2130_v57 = vmax.f32 %v2128_v20, %v2129_v28  ;;  %v2372_v42 = vsel %vm2353_vm3, %v2104_v52, %v2371_v32  ;;  %v778_v50 = vcombine.high %v770_v26, %v770_v26 }
  0xc3   :  { %v2125_v7 = vmax.f32 %v2123_v23, %v2124_v30  ;;  %v2373_v53 = vsel %vm2355_vm4, %v2111_v29, %v2372_v42  ;;  %v779_v63 = vcombine.high %v777_v34, %v777_v34  ;;  %v786_v40 = vrot.slane %v770_v26, %v2729_v5 }
  0xc4   :  { %v2131_v41 = vrot.slane %v2130_v57, 1  ;;  %v2374_v44 = vsel %vm2357_vm5, %v2118_v36, %v2373_v53  ;;  %v793_v45 = vrot.slane %v777_v34, %v2729_v5  ;;  %v800_v46 = vrot.slane %v778_v50, %v2729_v5 }
  0xc5   :  { %v2375_v60 = vsel %vm2359_vm6, %v2125_v7, %v2374_v44  ;;  %v807_v15 = vrot.slane %v779_v63, %v2729_v5  ;;  %v808_v48 = vcombine.high %v786_v40, %v786_v40  ;;  %v812_v49 = vcombine.high %v37_v1, %v37_v1 }
  0xc6   :  { %v2132_v31 = vmax.f32 %v2130_v57, %v2131_v41  ;;  %v810_v47 = vcombine.high %v800_v46, %v800_v46  ;;  %v819_v54 = vrot.slane %v37_v1, %v2729_v5  ;;  %v1753_v55 = vrot.slane %v1746_v61, %v2729_v5 }
  0xc7   :  { %v826_v56 = vrot.slane %v812_v49, %v2729_v5  ;;  %v1760_v43 = vrot.slane %v760_v25, %v2729_v5  ;;  %v1769_v58 = vcombine.low %v762_v33, %v2735_v16  ;;  %v1785_v59 = vcombine.low %v786_v40, %v800_v46 }
  0xc8   :  { %v2376_v62 = vsel %vm2361_vm7, %v2132_v31, %v2375_v60  ;;  %v827_v2 = vcombine.high %v819_v54, %v819_v54  ;;  %v835_v4 = vrot.slane %v819_v54, %v2729_v5  ;;  %v1799_v61 = vrot.slane %v808_v48, %v2729_v5 }
  0xc9   :  { %v3154_v6 = vsel %vm2404_vm8, %v2376_v62, -3.4028235e+38  ;;  %v828_v9 = vcombine.high %v826_v56, %v826_v56  ;;  %v842_v19 = vrot.slane %v826_v56, %v2729_v5  ;;  %v1761_v25 = vcombine.low %v1753_v55, %v1760_v43 }
  0xca   :  { %2445 = vrot.lane.b32.xlu1 %v3154_v6, %s2700_s0  ;;  %2421 = vrot.lane.b32.xlu0 %v3154_v6, %s2701_s20  ;;  %v849_v24 = vrot.slane %v827_v2, %v2729_v5  ;;  %v857_v33 = vcombine.high %v835_v4, %v835_v4  ;;  %v1776_v8 = vrot.slane %v1769_v58, %v2729_v5 }
  0xcb   :  { %v856_v10 = vrot.slane %v828_v9, %v2729_v5  ;;  %v858_v11 = vcombine.high %v842_v19, %v842_v19  ;;  %v1768_v13 = vrot.slane %v1761_v25, %v2729_v5  ;;  %v1792_v14 = vrot.slane %v1785_v59, %v2729_v5 }
  0xcc   :  { %v859_v18 = vcombine.high %v849_v24, %v849_v24  ;;  %v1777_v20 = vcombine.low %v1776_v8, %v2763_v51  ;;  %v1808_v21 = vcombine.low %v810_v47, %v793_v45  ;;  %v1822_v17 = vrot.slane %v807_v15, %v2729_v5 }
  0xcd   :  { %v860_v22 = vcombine.high %v856_v10, %v856_v10  ;;  %v1800_v23 = vcombine.low %v1792_v14, %v1799_v61  ;;  %v2609_v37 = vcombine.high %v793_v45, %v807_v15  ;;  %v1845_v52 = vrot.slane %v835_v4, %v2729_v5 }
  0xce   :  { %v1784_v27 = vrot.slane %v1777_v20, %v2729_v5  ;;  %v1815_v28 = vrot.slane %v1808_v21, %v2729_v5  ;;  %v1854_v26 = vcombine.low %v849_v24, %v857_v33  ;;  %v1868_v29 = vrot.slane %v859_v18, %v2729_v5  ;;  %2441 = vrot.lane.b32.xlu0 %v2999_v38, %s2700_s0 }
  0xcf   :  { %v1807_v30 = vrot.slane %v1800_v23, %v2729_v5  ;;  %v1838_v32 = vrot.slane %v2609_v37, %v2729_v5  ;;  %v1877_v34 = vcombine.low %v842_v19, %v856_v10  ;;  %v1891_v36 = vrot.slane %v858_v11, %v2729_v5 }
  0xd0   :  { %v1823_v57 = vcombine.low %v1815_v28, %v1822_v17  ;;  %v1861_v42 = vrot.slane %v1854_v26, %v2729_v5  ;;  %v1900_v1 = vcombine.low %v860_v22, %v2735_v16  ;;  %v2245_v50 = vsel %vm1964_vm0, %v1768_v13, -inf }
  0xd1   :  { %v1846_v7 = vcombine.low %v1838_v32, %v1845_v52  ;;  %v1884_v53 = vrot.slane %v1877_v34, %v2729_v5  ;;  %v2246_v63 = vrot.slane %v2245_v50, 4  ;;  %v2252_v40 = vsel %vm1964_vm0, %v1784_v27, -inf }
  0xd2   :  { %v1830_v41 = vrot.slane %v1823_v57, %v2729_v5  ;;  %v1869_v44 = vcombine.low %v1861_v42, %v1868_v29  ;;  %v1907_v45 = vrot.slane %v1900_v1, %v2729_v5  ;;  %v2253_v46 = vrot.slane %v2252_v40, 4  ;;  %2443 = vrot.lane.b32.xlu0 %v3082_v35, %s2700_s0 }
  0xd3   :  { %v1853_v60 = vrot.slane %v1846_v7, %v2729_v5  ;;  %v1892_v16 = vcombine.low %v1884_v53, %v1891_v36  ;;  %v2247_v15 = vmax.f32 %v2245_v50, %v2246_v63  ;;  %v2259_v48 = vsel %vm1964_vm0, %v1807_v30, -inf }
  0xd4   :  { %v1876_v49 = vrot.slane %v1869_v44, %v2729_v5  ;;  %v1908_v31 = vcombine.low %v1907_v45, %v2763_v51  ;;  %v2254_v47 = vmax.f32 %v2252_v40, %v2253_v46  ;;  %v2260_v54 = vrot.slane %v2259_v48, 4 }
  0xd5   :  { %v1899_v55 = vrot.slane %v1892_v16, %v2729_v5  ;;  %v2248_v56 = vrot.slane %v2247_v15, 2  ;;  %v2266_v43 = vsel %vm1964_vm0, %v1830_v41, -inf  ;;  %v2273_v58 = vsel %vm1964_vm0, %v1853_v60, -inf }
  0xd6   :  { %v1915_v59 = vrot.slane %v1908_v31, %v2729_v5  ;;  %v2255_v62 = vrot.slane %v2254_v47, 2  ;;  %v2261_v2 = vmax.f32 %v2259_v48, %v2260_v54  ;;  %v2267_v4 = vrot.slane %v2266_v43, 4 }
  0xd7   :  { %v2249_v61 = vmax.f32 %v2247_v15, %v2248_v56  ;;  %v2274_v9 = vrot.slane %v2273_v58, 4  ;;  %v2280_v19 = vsel %vm1964_vm0, %v1876_v49, -inf  ;;  %v2287_v51 = vsel %vm1964_vm0, %v1899_v55, -inf }
  0xd8   :  { %v2256_v25 = vmax.f32 %v2254_v47, %v2255_v62  ;;  %v2262_v24 = vrot.slane %v2261_v2, 2  ;;  %v2268_v33 = vmax.f32 %v2266_v43, %v2267_v4  ;;  %v2281_v8 = vrot.slane %v2280_v19, 4  ;;  %v2448_v62 = vpop.permute.xlu1 %2447 }
  0xd9   :  { %v2250_v10 = vrot.slane %v2249_v61, 1  ;;  %v2275_v11 = vmax.f32 %v2273_v58, %v2274_v9  ;;  %v2288_v13 = vrot.slane %v2287_v51, 4  ;;  %v2294_v14 = vsel %vm1964_vm0, %v1915_v59, -inf  ;;  %v2424_v59 = vpop.permute.xlu0 %2423 }
  0xda   :  { %v2257_v18 = vrot.slane %v2256_v25, 1  ;;  %v2263_v5 = vmax.f32 %v2261_v2, %v2262_v24  ;;  %v2269_v20 = vrot.slane %v2268_v33, 2  ;;  %v2282_v21 = vmax.f32 %v2280_v19, %v2281_v8 }
  0xdb   :  { %v2251_v17 = vmax.f32 %v2249_v61, %v2250_v10  ;;  %v2276_v22 = vrot.slane %v2275_v11, 2  ;;  %v2289_v23 = vmax.f32 %v2287_v51, %v2288_v13  ;;  %v2295_v37 = vrot.slane %v2294_v14, 4 }
  0xdc   :  { %v2258_v52 = vmax.f32 %v2256_v25, %v2257_v18  ;;  %v2264_v27 = vrot.slane %v2263_v5, 1  ;;  %v2270_v28 = vmax.f32 %v2268_v33, %v2269_v20  ;;  %v2283_v26 = vrot.slane %v2282_v21, 2  ;;  %v2426_v4 = vpop.permute.xlu1 %2425 }
  0xdd   :  { %v2277_v29 = vmax.f32 %v2275_v11, %v2276_v22  ;;  %v2290_v30 = vrot.slane %v2289_v23, 2  ;;  %v2296_v32 = vmax.f32 %v2294_v14, %v2295_v37  ;;  %v2467_v41 = vadd.s32 8, %v2726_v3 }
  0xde   :  { %v2265_v34 = vmax.f32 %v2263_v5, %v2264_v27  ;;  %v2271_v36 = vrot.slane %v2270_v28, 1  ;;  %v2284_v57 = vmax.f32 %v2282_v21, %v2283_v26  ;;  %v2391_v42 = vsel %vm2349_vm1, %v2258_v52, %v2251_v17 }
  0xdf   :  { %v2278_v1 = vrot.slane %v2277_v29, 1  ;;  %v2291_v50 = vmax.f32 %v2289_v23, %v2290_v30  ;;  %v2297_v7 = vrot.slane %v2296_v32, 2  ;;  %v2469_v60 = vand.u32 127, %v59_v0 }
  0xe0   :  { %v2272_v53 = vmax.f32 %v2270_v28, %v2271_v36  ;;  %v2285_v63 = vrot.slane %v2284_v57, 1  ;;  %v2392_v40 = vsel %vm2351_vm2, %v2265_v34, %v2391_v42  ;;  %v2702_v0 = vmov 1.0|1.0   ;;  %v2450_v61 = vpop.permute.xlu1 %2449 }
  0xe1   :  { %v2279_v44 = vmax.f32 %v2277_v29, %v2278_v1  ;;  %v2292_v45 = vrot.slane %v2291_v50, 1  ;;  %v2298_v46 = vmax.f32 %v2296_v32, %v2297_v7  ;;  %v2470_v47 = vmul.u32 3, %v2469_v60 }
  0xe2   :  { %v2286_v16 = vmax.f32 %v2284_v57, %v2285_v63  ;;  %v2393_v15 = vsel %vm2353_vm3, %v2272_v53, %v2392_v40  ;;  %v2438_v9 = vmax.f32 %v2835_v12, %v2424_v59  ;;  %v2439_v24 = vmax.f32 %v2911_v39, %v2426_v4 }
  0xe3   :  { %v2293_v48 = vmax.f32 %v2291_v50, %v2292_v45  ;;  %v2299_v49 = vrot.slane %v2298_v46, 1  ;;  %v2394_v31 = vsel %vm2355_vm4, %v2279_v44, %v2393_v15  ;;  %vm2471_vm9 = vcmp.eq.s32.totalorder %v2726_v3, %v2470_v47 }
  0xe4   :  { %v2395_v54 = vsel %vm2357_vm5, %v2286_v16, %v2394_v31  ;;  %vm2472_vm10 = vcmp.eq.s32.totalorder %v2467_v41, %v2470_v47  ;;  %v2462_v10 = vmax.f32 %v2438_v9, %v2448_v62  ;;  %v2463_v13 = vmax.f32 %v2439_v24, %v2450_v61 }
  0xe5   :  { %v2300_v55 = vmax.f32 %v2298_v46, %v2299_v49  ;;  %v2396_v56 = vsel %vm2359_vm6, %v2293_v48, %v2395_v54  ;;  %vm2641_vm11 = vmpackc.low %vm2472_vm10, %vm2471_vm9 }
  0xe6   :  { %2645 = vmatprep.subr.msk.bf16.mxu1 %vm2641_vm11, %v2702_v0  ;;  %2642 = vmatprep.subr.msk.bf16.mxu0 %vm2641_vm11, %v2702_v0 }
  0xe7   :  { %v2397_v43 = vsel %vm2361_vm7, %v2300_v55, %v2396_v56  ;;  %2646 = vmatpush3.bf16.msk.msra.mxu1 %vm2641_vm11, %v2702_v0  ;;  %2644 = vmatpush3.bf16.msk.msra.mxu0 %vm2641_vm11, %v2702_v0 }
  0xe8   :  { %v2410_v58 = vsel %vm2404_vm8, %v2397_v43, -3.4028235e+38 }
  0xe9   :  { %2427 = vrot.lane.b32.xlu1 %v2410_v58, %s2701_s20 }
  0xed   :  { %2451 = vrot.lane.b32.xlu1 %v2410_v58, %s2700_s0 }
  0xfa   :  { %v2418_v2 = vpop.permute.xlu0 %2417 }
  0xfb   :  { %v2435_v33 = vmax.f32 %v2999_v38, %v2418_v2 }
 0x11c   :  { %v2420_v3 = vpop.permute.xlu0 %2419 }
 0x11d   :  { %v2436_v18 = vmax.f32 %v3082_v35, %v2420_v3 }
 0x13c   :  { %v2422_v19 = vpop.permute.xlu0 %2421  ;;  %v2446_v25 = vpop.permute.xlu1 %2445 }
 0x13d   :  { %v2437_v51 = vmax.f32 %v3154_v6, %v2422_v19 }
 0x13f   :  { %v2461_v8 = vmax.f32 %v2437_v51, %v2446_v25 }
 0x140   :  { %v2442_v11 = vpop.permute.xlu0 %2441 }
 0x141   :  { %v2459_v14 = vmax.f32 %v2435_v33, %v2442_v11  ;;  %2635 = vmatprep.mubr.msk.f32.mxu1 %vm2404_vm8, %v2461_v8 }
 0x142   :  { %2636 = vmatmul.mubr.msk.f32.vlgmr.msra.gmra.mrb[0].mxu1 %vm2404_vm8, %v2462_v10 }
 0x143   :  { %2632 = vmatprep.mubr.msk.f32.mxu0 %vm2404_vm8, %v2459_v14  ;;  %2638 = vmatprep.mubr.msk.f32.mxu1 %vm2404_vm8, %v2463_v13 }
 0x144   :  { %v2444_v12 = vpop.permute.xlu0 %2443 }
 0x145   :  { %v2460_v6 = vmax.f32 %v2436_v18, %v2444_v12 }
 0x147   :  { %2633 = vmatmul.mubr.msk.f32.vlgmr.msra.gmra.mrb[0].mxu0 %vm2404_vm8, %v2460_v6 }
 0x15b   :  { %v2428_v39 = vpop.permute.xlu1 %2427 }
 0x15c   :  { %v2440_v38 = vmax.f32 %v2410_v58, %v2428_v39 }
 0x15f   :  { %v2452_v5 = vpop.permute.xlu1 %2451 }
 0x160   :  { %v2464_v20 = vmax.f32 %v2440_v38, %v2452_v5 }
 0x162   :  { %2639 = vmatmul.mubr.msk.f32.gmra.mrb[2].mxu1 %vm2404_vm8, %v2464_v20 }
 0x215   :  { %v2637_v21 = vpop.f32.mrb[0].mxu1 }
 0x216   :  { %2594 = vst.msk [vmem:[%s3240_s1 + $0x18] sm:$0xff] %vm2590_vm12, %v2637_v21  ;;  %v2571_v35 = vpop.f32.mrb[1].mxu1 }
 0x217   :  { %2593 = vst.msk [vmem:[%s3240_s1 + $0x10] sm:$0xff] %vm2590_vm12, %v2571_v35 }
 0x21a   :  { %v2634_v17 = vpop.f32.mrb[0].mxu0 }
 0x21b   :  { %2592 = vst.msk [vmem:[%s3240_s1 + $0x8] sm:$0xff] %vm2590_vm12, %v2634_v17  ;;  %v2561_v22 = vpop.f32.mrb[1].mxu0 }
 0x21c   :  { %2591 = vst.msk [vmem:[%s3240_s1] sm:$0xff] %vm2590_vm12, %v2561_v22 }
 0x235   :  { %v2640_v23 = vpop.f32.mrb[2].mxu1 }
 0x236   :  { %2596 = vst.msk [vmem:[%s3240_s1 + $0x28] sm:$0xff] %vm2590_vm12, %v2640_v23  ;;  %v2581_v37 = vpop.f32.mrb[3].mxu1 }
 0x237   :  { %2595 = vst.msk [vmem:[%s3240_s1 + $0x20] sm:$0xff] %vm2590_vm12, %v2581_v37 }
 0x238   :  { %2601 = vsyncpa [#allocation3], 1 }

</bundles_post_ra>
